<compile_context>
chip_gen: v5e
topology: v5e:2x2
jax: 0.10.0
libtpu: 0.0.40
codegen_flags: <defaults>
</compile_context>

<pallas_src>
import functools

import jax
import jax.numpy as jnp
from jax import lax
from jax.experimental import pallas as pl
from jax.experimental.pallas import tpu as pltpu

LN_EPS = 1e-5   # torch.nn.LayerNorm default
LANE = 128
SUBLANE = 8
MAX_TB = 512    # batch rows per grid step for large batches


def _round_up(x, m):
    return ((x + m - 1) // m) * m


# ----------------------------------------------------------------------------
# Kernel
# ----------------------------------------------------------------------------
def critic_kernel(x_ref, a_ref, w_ref, p_ref, out_ref, *, ln_dims):
    """Critic forward on one lane-dense (TB, F) batch tile.

    x_ref  : (TB, F) inputs, real data in lanes [0:num_inputs], zeros elsewhere
    a_ref  : (TB, F) actions pre-placed in lanes [h2:h2+num_actions]
    w_ref  : (5, F, F) bf16 zero-padded weights [W1, W2, W3, W4(cat), W5]
    p_ref  : (24, F) f32 vectors: rows 3i/3i+1/3i+2 = (b, gamma, beta) of layer
             i in 0..4, row 15 = V weight as a lane row, row 16 = V bias in
             lane 0, rows 17..23 = zero padding.
    out_ref: (TB, F) output slab, V in lane 0 (other lanes exactly 0)
    """
    h0, h1, h2, h3, h4 = ln_dims

    def dense_ln_relu(x, wi, pi, d_real):
        # bf16 operands on the MXU, f32 accumulation.  Padded output lanes of
        # h are exactly zero (zero-padded W columns, zero-padded bias).
        h = jnp.dot(x.astype(jnp.bfloat16), w_ref[wi],
                    preferred_element_type=jnp.float32)
        h = h + p_ref[pl.ds(pi, 1), :]
        # Single-pass LayerNorm over the *real* feature width; padded lanes
        # are exactly 0 so full-width sums are correct.
        inv_d = 1.0 / float(d_real)
        mu = jnp.sum(h, axis=-1, keepdims=True) * inv_d
        ex2 = jnp.sum(h * h, axis=-1, keepdims=True) * inv_d
        var = jnp.maximum(ex2 - mu * mu, 0.0)   # clamp cancellation / pad rows
        hn = (h - mu) * lax.rsqrt(var + LN_EPS)
        # gamma/beta are zero in padded lanes -> padded lanes stay exactly 0.
        return jnp.maximum(
            hn * p_ref[pl.ds(pi + 1, 1), :] + p_ref[pl.ds(pi + 2, 1), :], 0.0)

    x = x_ref[...]
    x = dense_ln_relu(x, 0, 0, h0)
    x = dense_ln_relu(x, 1, 3, h1)
    x = dense_ln_relu(x, 2, 6, h2)
    # cat([x, actions], 1) == add: x is exactly zero in lanes >= h2, actions
    # slab holds the actions at lanes [h2:h2+num_actions].
    x = dense_ln_relu(x + a_ref[...], 3, 9, h3)
    x = dense_ln_relu(x, 4, 12, h4)

    # Final V: only one real output column -> skip the MXU.  VPU multiply +
    # XLU lane reduce, then a lane-dense store with V in lane 0.
    v = jnp.sum(x * p_ref[pl.ds(15, 1), :], axis=-1, keepdims=True)   # (TB, 1)
    lane = lax.broadcasted_iota(jnp.int32, out_ref.shape, 1)
    out_ref[...] = jnp.where(lane == 0, v, 0.0) + p_ref[pl.ds(16, 1), :]


# ----------------------------------------------------------------------------
# Parameter packing (done once, outside the hot path)
# ----------------------------------------------------------------------------
def pack_params(flat, num_inputs, num_actions, hidden):
    (w1, b1, g1, be1,
     w2, b2, g2, be2,
     w3, b3, g3, be3,
     w4, b4, g4, be4,
     w5, b5, g5, be5,
     wv, bv) = flat
    h0, h1, h2, h3, h4 = hidden

    F = _round_up(max(num_inputs, h0, h1, h2 + num_actions, h3, h4), LANE)

    def pad_w(w):
        out = jnp.zeros((F, F), jnp.float32)
        return out.at[: w.shape[0], : w.shape[1]].set(w)

    def pad_v(v):
        out = jnp.zeros((F,), jnp.float32)
        return out.at[: v.shape[0]].set(v)

    # bf16 weight slab for the MXU; exact-zero padding survives the cast.
    w_slab = jnp.stack(
        [pad_w(w1), pad_w(w2), pad_w(w3), pad_w(w4), pad_w(w5)]
    ).astype(jnp.bfloat16)

    rows = [pad_v(b1), pad_v(g1), pad_v(be1),
            pad_v(b2), pad_v(g2), pad_v(be2),
            pad_v(b3), pad_v(g3), pad_v(be3),
            pad_v(b4), pad_v(g4), pad_v(be4),
            pad_v(b5), pad_v(g5), pad_v(be5),
            pad_v(wv[:, 0]),     # row 15: V weight as a lane row
            pad_v(bv)]           # row 16: V bias in lane 0
    rows += [jnp.zeros((F,), jnp.float32)] * (24 - len(rows))   # sublane pad
    p_slab = jnp.stack(rows)

    meta = dict(ln_dims=(h0, h1, h2, h3, h4), h2=h2)
    return w_slab, p_slab, meta


# ----------------------------------------------------------------------------
# Wrapper
# ----------------------------------------------------------------------------
def critic_forward(inputs, actions, w_slab, p_slab, *, ln_dims, h2):
    """inputs: (B, num_inputs), actions: (B, num_actions) -> V: (B, 1)."""
    B, num_inputs = inputs.shape
    na = actions.shape[1]
    F = w_slab.shape[-1]
    NP = p_slab.shape[0]

    # Batch tiling: single step for small batches, MAX_TB-row tiles otherwise.
    if B <= MAX_TB:
        TB = _round_up(max(B, SUBLANE), SUBLANE)
        Bp = TB
    else:
        TB = MAX_TB
        Bp = _round_up(B, TB)

    # Lane/sublane-dense activation slabs; actions placed at their concat
    # offset so the kernel only needs an add (no cross-lane shuffle).  With
    # allow_input_fusion these producers fuse into the pallas_call.
    x_pad = jnp.zeros((Bp, F), jnp.float32).at[:B, :num_inputs].set(
        inputs.astype(jnp.float32))
    a_pad = jnp.zeros((Bp, F), jnp.float32).at[:B, h2:h2 + na].set(
        actions.astype(jnp.float32))

    grid_spec = pltpu.PrefetchScalarGridSpec(
        num_scalar_prefetch=0,
        grid=(Bp // TB,),
        in_specs=[
            pl.BlockSpec((TB, F), lambda i: (i, 0)),           # inputs tile
            pl.BlockSpec((TB, F), lambda i: (i, 0)),           # actions tile
            pl.BlockSpec(w_slab.shape, lambda i: (0, 0, 0)),   # weights (resident)
            pl.BlockSpec((NP, F), lambda i: (0, 0)),           # params  (resident)
        ],
        out_specs=pl.BlockSpec((TB, F), lambda i: (i, 0)),
    )

    out = pl.pallas_call(
        functools.partial(critic_kernel, ln_dims=ln_dims),
        out_shape=jax.ShapeDtypeStruct((Bp, F), jnp.float32),
        grid_spec=grid_spec,
        compiler_params=pltpu.CompilerParams(
            dimension_semantics=("parallel",),
            allow_input_fusion=[True, True, False, False],
        ),
    )(x_pad, a_pad, w_slab, p_slab)
    return out[:B, :1]


# jit the whole thing so repeated critic evaluations amortize launch overhead
critic_apply = jax.jit(critic_forward, static_argnames=("ln_dims", "h2"))


# ----------------------------------------------------------------------------
# Init (mimics nn.Linear default uniform init + LayerNorm(1, 0)) and reference
# ----------------------------------------------------------------------------
def init_params(key, num_inputs, num_actions, hidden):
    h0, h1, h2, h3, h4 = hidden

    def linear(key, fan_in, fan_out):
        k1, k2 = jax.random.split(key)
        bound = float(fan_in) ** -0.5
        w = jax.random.uniform(k1, (fan_in, fan_out), jnp.float32, -bound, bound)
        b = jax.random.uniform(k2, (fan_out,), jnp.float32, -bound, bound)
        return w, b

    def ln(dim):
        return jnp.ones((dim,), jnp.float32), jnp.zeros((dim,), jnp.float32)

    keys = jax.random.split(key, 6)
    w1, b1 = linear(keys[0], num_inputs, h0);          g1, be1 = ln(h0)
    w2, b2 = linear(keys[1], h0, h1);                  g2, be2 = ln(h1)
    w3, b3 = linear(keys[2], h1, h2);                  g3, be3 = ln(h2)
    w4, b4 = linear(keys[3], h2 + num_actions, h3);    g4, be4 = ln(h3)
    w5, b5 = linear(keys[4], h3, h4);                  g5, be5 = ln(h4)
    wv, bv = linear(keys[5], h4, 1)

    return [w1, b1, g1, be1,
            w2, b2, g2, be2,
            w3, b3, g3, be3,
            w4, b4, g4, be4,
            w5, b5, g5, be5,
            wv, bv]


def critic_reference(inputs, actions, p, matmul_dtype=jnp.float32):
    """Plain-JAX reference (mirrors the PyTorch module) for validation.

    matmul_dtype=bf16 mimics the kernel's operand casting (f32 accumulation,
    f32 LayerNorm) for a tight numerical check.
    """
    (w1, b1, g1, be1, w2, b2, g2, be2, w3, b3, g3, be3,
     w4, b4, g4, be4, w5, b5, g5, be5, wv, bv) = p

    def mm(x, w):
        return jnp.dot(x.astype(matmul_dtype), w.astype(matmul_dtype),
                       preferred_element_type=jnp.float32)

    def ln_relu(h, g, be):
        mu = jnp.mean(h, -1, keepdims=True)
        var = jnp.mean((h - mu) ** 2, -1, keepdims=True)
        return jnp.maximum((h - mu) / jnp.sqrt(var + LN_EPS) * g + be, 0.0)

    x = ln_relu(mm(inputs, w1) + b1, g1, be1)
    x = ln_relu(mm(x, w2) + b2, g2, be2)
    x = ln_relu(mm(x, w3) + b3, g3, be3)
    x = ln_relu(mm(jnp.concatenate([x, actions], axis=1), w4) + b4, g4, be4)
    x = ln_relu(mm(x, w5) + b5, g5, be5)
    return x @ wv + bv   # final V layer is f32 in the kernel too


# ----------------------------------------------------------------------------
if __name__ == "__main__":
    key = jax.random.PRNGKey(0)
    k_in, k_act, k_par = jax.random.split(key, 3)

    num_inputs = 16
    num_actions = 4
    hidden = (32, 32, 32, 32, 32)

    params = init_params(k_par, num_inputs, num_actions, hidden)
    w_slab, p_slab, meta = pack_params(params, num_inputs, num_actions, hidden)

    # --- small batch (single grid step) ---
    batch = 4
    inputs = jax.random.normal(k_in, (batch, num_inputs), jnp.float32)
    actions = jax.random.normal(k_act, (batch, num_actions), jnp.float32)

    v = critic_apply(inputs, actions, w_slab, p_slab,
                     ln_dims=meta["ln_dims"], h2=meta["h2"])
    v = jax.block_until_ready(v)
    assert v.shape == (batch, 1)

    v_ref_bf16 = critic_reference(inputs, actions, params, jnp.bfloat16)
    v_ref_f32 = critic_reference(inputs, actions, params, jnp.float32)
    # Tight check against a reference with identical bf16 operand casting,
    # loose sanity check against the full-f32 reference.
    assert jnp.allclose(v, v_ref_bf16, atol=2e-3, rtol=1e-3)
    assert jnp.allclose(v, v_ref_f32, atol=1.5e-1, rtol=5e-2)

    # --- larger batch (multi-tile parallel grid + row padding) ---
    batch2 = 600
    k_in2, k_act2 = jax.random.split(jax.random.PRNGKey(1))
    inputs2 = jax.random.normal(k_in2, (batch2, num_inputs), jnp.float32)
    actions2 = jax.random.normal(k_act2, (batch2, num_actions), jnp.float32)

    v2 = critic_apply(inputs2, actions2, w_slab, p_slab,
                      ln_dims=meta["ln_dims"], h2=meta["h2"])
    v2 = jax.block_until_ready(v2)
    assert v2.shape == (batch2, 1)
    v2_ref_bf16 = critic_reference(inputs2, actions2, params, jnp.bfloat16)
    assert jnp.allclose(v2, v2_ref_bf16, atol=2e-3, rtol=1e-3)

    print("KERNEL_OK")
</pallas_src>

<mosaic_0001>
module attributes {stable_mosaic.version = 11 : i64} {
  func.func @critic_kernel(%arg0: i32, %arg1: memref<8x128xf32, #tpu.memory_space<vmem>>, %arg2: memref<8x128xf32, #tpu.memory_space<vmem>>, %arg3: memref<5x128x128xbf16, #tpu.memory_space<vmem>>, %arg4: memref<24x128xf32, #tpu.memory_space<vmem>>, %arg5: memref<8x128xf32, #tpu.memory_space<vmem>>) attributes {dimension_semantics = [#tpu.dimension_semantics<parallel>], iteration_bounds = array<i64: 1>, scalar_prefetch = 0 : i64, scratch_operands = 0 : i64, tpu.core_type = #tpu.core_type<tc>, window_params = [{transform_indices = @transform_0, window_bounds = array<i64: 8, 128>}, {transform_indices = @transform_1, window_bounds = array<i64: 8, 128>}, {pipeline_mode = #tpu.pipeline_mode<synchronous>, transform_indices = @transform_2, window_bounds = array<i64: 5, 128, 128>}, {pipeline_mode = #tpu.pipeline_mode<synchronous>, transform_indices = @transform_3, window_bounds = array<i64: 24, 128>}, {transform_indices = @transform_4, window_bounds = array<i64: 8, 128>}]} {
    %c0 = arith.constant 0 : index
    %c0_0 = arith.constant 0 : index
    %0 = vector.load %arg1[%c0, %c0_0] : memref<8x128xf32, #tpu.memory_space<vmem>>, vector<8x128xf32>
    %1 = arith.truncf %0 : vector<8x128xf32> to vector<8x128xbf16>
    %c0_1 = arith.constant 0 : index
    %c0_2 = arith.constant 0 : index
    %c0_3 = arith.constant 0 : index
    %2 = vector.load %arg3[%c0_1, %c0_2, %c0_3] : memref<5x128x128xbf16, #tpu.memory_space<vmem>>, vector<1x128x128xbf16>
    %3 = vector.shape_cast %2 : vector<1x128x128xbf16> to vector<128x128xbf16>
    %cst = arith.constant dense<0.000000e+00> : vector<8x128xf32>
    %4 = tpu.matmul %1, %3, %cst {dimension_numbers = #tpu.dot_dimension_numbers<[1], [0], [0], [1], [0, 0, 1, 1], [], []>} : vector<8x128xbf16>, vector<128x128xbf16>, vector<8x128xf32> -> vector<8x128xf32>
    %c0_4 = arith.constant 0 : index
    %c0_5 = arith.constant 0 : index
    %5 = vector.load %arg4[%c0_4, %c0_5] : memref<24x128xf32, #tpu.memory_space<vmem>>, vector<1x128xf32>
    %6 = vector.broadcast %5 : vector<1x128xf32> to vector<8x128xf32>
    %7 = arith.addf %4, %6 : vector<8x128xf32>
    %cst_6 = arith.constant dense<0.000000e+00> : vector<8xf32>
    %8 = vector.multi_reduction <add>, %7, %cst_6 [1] : vector<8x128xf32> to vector<8xf32>
    %9 = vector.shape_cast %8 : vector<8xf32> to vector<8x1xf32>
    %cst_7 = arith.constant 3.125000e-02 : f32
    %10 = vector.broadcast %cst_7 : f32 to vector<8x1xf32>
    %11 = arith.mulf %9, %10 : vector<8x1xf32>
    %12 = arith.mulf %7, %7 : vector<8x128xf32>
    %cst_8 = arith.constant dense<0.000000e+00> : vector<8xf32>
    %13 = vector.multi_reduction <add>, %12, %cst_8 [1] : vector<8x128xf32> to vector<8xf32>
    %14 = vector.shape_cast %13 : vector<8xf32> to vector<8x1xf32>
    %cst_9 = arith.constant 3.125000e-02 : f32
    %15 = vector.broadcast %cst_9 : f32 to vector<8x1xf32>
    %16 = arith.mulf %14, %15 : vector<8x1xf32>
    %17 = arith.mulf %11, %11 : vector<8x1xf32>
    %18 = arith.subf %16, %17 : vector<8x1xf32>
    %cst_10 = arith.constant 0.000000e+00 : f32
    %19 = vector.broadcast %cst_10 : f32 to vector<8x1xf32>
    %20 = arith.maximumf %18, %19 : vector<8x1xf32>
    %21 = vector.broadcast %11 : vector<8x1xf32> to vector<8x128xf32>
    %22 = arith.subf %7, %21 : vector<8x128xf32>
    %cst_11 = arith.constant 9.99999974E-6 : f32
    %23 = vector.broadcast %cst_11 : f32 to vector<8x1xf32>
    %24 = arith.addf %20, %23 : vector<8x1xf32>
    %25 = math.rsqrt %24 : vector<8x1xf32>
    %26 = vector.broadcast %25 : vector<8x1xf32> to vector<8x128xf32>
    %27 = arith.mulf %22, %26 : vector<8x128xf32>
    %c1 = arith.constant 1 : index
    %c0_12 = arith.constant 0 : index
    %28 = vector.load %arg4[%c1, %c0_12] : memref<24x128xf32, #tpu.memory_space<vmem>>, vector<1x128xf32>
    %29 = vector.broadcast %28 : vector<1x128xf32> to vector<8x128xf32>
    %30 = arith.mulf %27, %29 : vector<8x128xf32>
    %c2 = arith.constant 2 : index
    %c0_13 = arith.constant 0 : index
    %31 = vector.load %arg4[%c2, %c0_13] : memref<24x128xf32, #tpu.memory_space<vmem>>, vector<1x128xf32>
    %32 = vector.broadcast %31 : vector<1x128xf32> to vector<8x128xf32>
    %33 = arith.addf %30, %32 : vector<8x128xf32>
    %cst_14 = arith.constant 0.000000e+00 : f32
    %34 = vector.broadcast %cst_14 : f32 to vector<8x128xf32>
    %35 = arith.maximumf %33, %34 : vector<8x128xf32>
    %36 = arith.truncf %35 : vector<8x128xf32> to vector<8x128xbf16>
    %c1_15 = arith.constant 1 : index
    %c0_16 = arith.constant 0 : index
    %c0_17 = arith.constant 0 : index
    %37 = vector.load %arg3[%c1_15, %c0_16, %c0_17] : memref<5x128x128xbf16, #tpu.memory_space<vmem>>, vector<1x128x128xbf16>
    %38 = vector.shape_cast %37 : vector<1x128x128xbf16> to vector<128x128xbf16>
    %cst_18 = arith.constant dense<0.000000e+00> : vector<8x128xf32>
    %39 = tpu.matmul %36, %38, %cst_18 {dimension_numbers = #tpu.dot_dimension_numbers<[1], [0], [0], [1], [0, 0, 1, 1], [], []>} : vector<8x128xbf16>, vector<128x128xbf16>, vector<8x128xf32> -> vector<8x128xf32>
    %c3 = arith.constant 3 : index
    %c0_19 = arith.constant 0 : index
    %40 = vector.load %arg4[%c3, %c0_19] : memref<24x128xf32, #tpu.memory_space<vmem>>, vector<1x128xf32>
    %41 = vector.broadcast %40 : vector<1x128xf32> to vector<8x128xf32>
    %42 = arith.addf %39, %41 : vector<8x128xf32>
    %cst_20 = arith.constant dense<0.000000e+00> : vector<8xf32>
    %43 = vector.multi_reduction <add>, %42, %cst_20 [1] : vector<8x128xf32> to vector<8xf32>
    %44 = vector.shape_cast %43 : vector<8xf32> to vector<8x1xf32>
    %cst_21 = arith.constant 3.125000e-02 : f32
    %45 = vector.broadcast %cst_21 : f32 to vector<8x1xf32>
    %46 = arith.mulf %44, %45 : vector<8x1xf32>
    %47 = arith.mulf %42, %42 : vector<8x128xf32>
    %cst_22 = arith.constant dense<0.000000e+00> : vector<8xf32>
    %48 = vector.multi_reduction <add>, %47, %cst_22 [1] : vector<8x128xf32> to vector<8xf32>
    %49 = vector.shape_cast %48 : vector<8xf32> to vector<8x1xf32>
    %cst_23 = arith.constant 3.125000e-02 : f32
    %50 = vector.broadcast %cst_23 : f32 to vector<8x1xf32>
    %51 = arith.mulf %49, %50 : vector<8x1xf32>
    %52 = arith.mulf %46, %46 : vector<8x1xf32>
    %53 = arith.subf %51, %52 : vector<8x1xf32>
    %cst_24 = arith.constant 0.000000e+00 : f32
    %54 = vector.broadcast %cst_24 : f32 to vector<8x1xf32>
    %55 = arith.maximumf %53, %54 : vector<8x1xf32>
    %56 = vector.broadcast %46 : vector<8x1xf32> to vector<8x128xf32>
    %57 = arith.subf %42, %56 : vector<8x128xf32>
    %cst_25 = arith.constant 9.99999974E-6 : f32
    %58 = vector.broadcast %cst_25 : f32 to vector<8x1xf32>
    %59 = arith.addf %55, %58 : vector<8x1xf32>
    %60 = math.rsqrt %59 : vector<8x1xf32>
    %61 = vector.broadcast %60 : vector<8x1xf32> to vector<8x128xf32>
    %62 = arith.mulf %57, %61 : vector<8x128xf32>
    %c4 = arith.constant 4 : index
    %c0_26 = arith.constant 0 : index
    %63 = vector.load %arg4[%c4, %c0_26] : memref<24x128xf32, #tpu.memory_space<vmem>>, vector<1x128xf32>
    %64 = vector.broadcast %63 : vector<1x128xf32> to vector<8x128xf32>
    %65 = arith.mulf %62, %64 : vector<8x128xf32>
    %c5 = arith.constant 5 : index
    %c0_27 = arith.constant 0 : index
    %66 = vector.load %arg4[%c5, %c0_27] : memref<24x128xf32, #tpu.memory_space<vmem>>, vector<1x128xf32>
    %67 = vector.broadcast %66 : vector<1x128xf32> to vector<8x128xf32>
    %68 = arith.addf %65, %67 : vector<8x128xf32>
    %cst_28 = arith.constant 0.000000e+00 : f32
    %69 = vector.broadcast %cst_28 : f32 to vector<8x128xf32>
    %70 = arith.maximumf %68, %69 : vector<8x128xf32>
    %71 = arith.truncf %70 : vector<8x128xf32> to vector<8x128xbf16>
    %c2_29 = arith.constant 2 : index
    %c0_30 = arith.constant 0 : index
    %c0_31 = arith.constant 0 : index
    %72 = vector.load %arg3[%c2_29, %c0_30, %c0_31] : memref<5x128x128xbf16, #tpu.memory_space<vmem>>, vector<1x128x128xbf16>
    %73 = vector.shape_cast %72 : vector<1x128x128xbf16> to vector<128x128xbf16>
    %cst_32 = arith.constant dense<0.000000e+00> : vector<8x128xf32>
    %74 = tpu.matmul %71, %73, %cst_32 {dimension_numbers = #tpu.dot_dimension_numbers<[1], [0], [0], [1], [0, 0, 1, 1], [], []>} : vector<8x128xbf16>, vector<128x128xbf16>, vector<8x128xf32> -> vector<8x128xf32>
    %c6 = arith.constant 6 : index
    %c0_33 = arith.constant 0 : index
    %75 = vector.load %arg4[%c6, %c0_33] : memref<24x128xf32, #tpu.memory_space<vmem>>, vector<1x128xf32>
    %76 = vector.broadcast %75 : vector<1x128xf32> to vector<8x128xf32>
    %77 = arith.addf %74, %76 : vector<8x128xf32>
    %cst_34 = arith.constant dense<0.000000e+00> : vector<8xf32>
    %78 = vector.multi_reduction <add>, %77, %cst_34 [1] : vector<8x128xf32> to vector<8xf32>
    %79 = vector.shape_cast %78 : vector<8xf32> to vector<8x1xf32>
    %cst_35 = arith.constant 3.125000e-02 : f32
    %80 = vector.broadcast %cst_35 : f32 to vector<8x1xf32>
    %81 = arith.mulf %79, %80 : vector<8x1xf32>
    %82 = arith.mulf %77, %77 : vector<8x128xf32>
    %cst_36 = arith.constant dense<0.000000e+00> : vector<8xf32>
    %83 = vector.multi_reduction <add>, %82, %cst_36 [1] : vector<8x128xf32> to vector<8xf32>
    %84 = vector.shape_cast %83 : vector<8xf32> to vector<8x1xf32>
    %cst_37 = arith.constant 3.125000e-02 : f32
    %85 = vector.broadcast %cst_37 : f32 to vector<8x1xf32>
    %86 = arith.mulf %84, %85 : vector<8x1xf32>
    %87 = arith.mulf %81, %81 : vector<8x1xf32>
    %88 = arith.subf %86, %87 : vector<8x1xf32>
    %cst_38 = arith.constant 0.000000e+00 : f32
    %89 = vector.broadcast %cst_38 : f32 to vector<8x1xf32>
    %90 = arith.maximumf %88, %89 : vector<8x1xf32>
    %91 = vector.broadcast %81 : vector<8x1xf32> to vector<8x128xf32>
    %92 = arith.subf %77, %91 : vector<8x128xf32>
    %cst_39 = arith.constant 9.99999974E-6 : f32
    %93 = vector.broadcast %cst_39 : f32 to vector<8x1xf32>
    %94 = arith.addf %90, %93 : vector<8x1xf32>
    %95 = math.rsqrt %94 : vector<8x1xf32>
    %96 = vector.broadcast %95 : vector<8x1xf32> to vector<8x128xf32>
    %97 = arith.mulf %92, %96 : vector<8x128xf32>
    %c7 = arith.constant 7 : index
    %c0_40 = arith.constant 0 : index
    %98 = vector.load %arg4[%c7, %c0_40] : memref<24x128xf32, #tpu.memory_space<vmem>>, vector<1x128xf32>
    %99 = vector.broadcast %98 : vector<1x128xf32> to vector<8x128xf32>
    %100 = arith.mulf %97, %99 : vector<8x128xf32>
    %c8 = arith.constant 8 : index
    %c0_41 = arith.constant 0 : index
    %101 = vector.load %arg4[%c8, %c0_41] : memref<24x128xf32, #tpu.memory_space<vmem>>, vector<1x128xf32>
    %102 = vector.broadcast %101 : vector<1x128xf32> to vector<8x128xf32>
    %103 = arith.addf %100, %102 : vector<8x128xf32>
    %cst_42 = arith.constant 0.000000e+00 : f32
    %104 = vector.broadcast %cst_42 : f32 to vector<8x128xf32>
    %105 = arith.maximumf %103, %104 : vector<8x128xf32>
    %c0_43 = arith.constant 0 : index
    %c0_44 = arith.constant 0 : index
    %106 = vector.load %arg2[%c0_43, %c0_44] : memref<8x128xf32, #tpu.memory_space<vmem>>, vector<8x128xf32>
    %107 = arith.addf %105, %106 : vector<8x128xf32>
    %108 = arith.truncf %107 : vector<8x128xf32> to vector<8x128xbf16>
    %c3_45 = arith.constant 3 : index
    %c0_46 = arith.constant 0 : index
    %c0_47 = arith.constant 0 : index
    %109 = vector.load %arg3[%c3_45, %c0_46, %c0_47] : memref<5x128x128xbf16, #tpu.memory_space<vmem>>, vector<1x128x128xbf16>
    %110 = vector.shape_cast %109 : vector<1x128x128xbf16> to vector<128x128xbf16>
    %cst_48 = arith.constant dense<0.000000e+00> : vector<8x128xf32>
    %111 = tpu.matmul %108, %110, %cst_48 {dimension_numbers = #tpu.dot_dimension_numbers<[1], [0], [0], [1], [0, 0, 1, 1], [], []>} : vector<8x128xbf16>, vector<128x128xbf16>, vector<8x128xf32> -> vector<8x128xf32>
    %c9 = arith.constant 9 : index
    %c0_49 = arith.constant 0 : index
    %112 = vector.load %arg4[%c9, %c0_49] : memref<24x128xf32, #tpu.memory_space<vmem>>, vector<1x128xf32>
    %113 = vector.broadcast %112 : vector<1x128xf32> to vector<8x128xf32>
    %114 = arith.addf %111, %113 : vector<8x128xf32>
    %cst_50 = arith.constant dense<0.000000e+00> : vector<8xf32>
    %115 = vector.multi_reduction <add>, %114, %cst_50 [1] : vector<8x128xf32> to vector<8xf32>
    %116 = vector.shape_cast %115 : vector<8xf32> to vector<8x1xf32>
    %cst_51 = arith.constant 3.125000e-02 : f32
    %117 = vector.broadcast %cst_51 : f32 to vector<8x1xf32>
    %118 = arith.mulf %116, %117 : vector<8x1xf32>
    %119 = arith.mulf %114, %114 : vector<8x128xf32>
    %cst_52 = arith.constant dense<0.000000e+00> : vector<8xf32>
    %120 = vector.multi_reduction <add>, %119, %cst_52 [1] : vector<8x128xf32> to vector<8xf32>
    %121 = vector.shape_cast %120 : vector<8xf32> to vector<8x1xf32>
    %cst_53 = arith.constant 3.125000e-02 : f32
    %122 = vector.broadcast %cst_53 : f32 to vector<8x1xf32>
    %123 = arith.mulf %121, %122 : vector<8x1xf32>
    %124 = arith.mulf %118, %118 : vector<8x1xf32>
    %125 = arith.subf %123, %124 : vector<8x1xf32>
    %cst_54 = arith.constant 0.000000e+00 : f32
    %126 = vector.broadcast %cst_54 : f32 to vector<8x1xf32>
    %127 = arith.maximumf %125, %126 : vector<8x1xf32>
    %128 = vector.broadcast %118 : vector<8x1xf32> to vector<8x128xf32>
    %129 = arith.subf %114, %128 : vector<8x128xf32>
    %cst_55 = arith.constant 9.99999974E-6 : f32
    %130 = vector.broadcast %cst_55 : f32 to vector<8x1xf32>
    %131 = arith.addf %127, %130 : vector<8x1xf32>
    %132 = math.rsqrt %131 : vector<8x1xf32>
    %133 = vector.broadcast %132 : vector<8x1xf32> to vector<8x128xf32>
    %134 = arith.mulf %129, %133 : vector<8x128xf32>
    %c10 = arith.constant 10 : index
    %c0_56 = arith.constant 0 : index
    %135 = vector.load %arg4[%c10, %c0_56] : memref<24x128xf32, #tpu.memory_space<vmem>>, vector<1x128xf32>
    %136 = vector.broadcast %135 : vector<1x128xf32> to vector<8x128xf32>
    %137 = arith.mulf %134, %136 : vector<8x128xf32>
    %c11 = arith.constant 11 : index
    %c0_57 = arith.constant 0 : index
    %138 = vector.load %arg4[%c11, %c0_57] : memref<24x128xf32, #tpu.memory_space<vmem>>, vector<1x128xf32>
    %139 = vector.broadcast %138 : vector<1x128xf32> to vector<8x128xf32>
    %140 = arith.addf %137, %139 : vector<8x128xf32>
    %cst_58 = arith.constant 0.000000e+00 : f32
    %141 = vector.broadcast %cst_58 : f32 to vector<8x128xf32>
    %142 = arith.maximumf %140, %141 : vector<8x128xf32>
    %143 = arith.truncf %142 : vector<8x128xf32> to vector<8x128xbf16>
    %c4_59 = arith.constant 4 : index
    %c0_60 = arith.constant 0 : index
    %c0_61 = arith.constant 0 : index
    %144 = vector.load %arg3[%c4_59, %c0_60, %c0_61] : memref<5x128x128xbf16, #tpu.memory_space<vmem>>, vector<1x128x128xbf16>
    %145 = vector.shape_cast %144 : vector<1x128x128xbf16> to vector<128x128xbf16>
    %cst_62 = arith.constant dense<0.000000e+00> : vector<8x128xf32>
    %146 = tpu.matmul %143, %145, %cst_62 {dimension_numbers = #tpu.dot_dimension_numbers<[1], [0], [0], [1], [0, 0, 1, 1], [], []>} : vector<8x128xbf16>, vector<128x128xbf16>, vector<8x128xf32> -> vector<8x128xf32>
    %c12 = arith.constant 12 : index
    %c0_63 = arith.constant 0 : index
    %147 = vector.load %arg4[%c12, %c0_63] : memref<24x128xf32, #tpu.memory_space<vmem>>, vector<1x128xf32>
    %148 = vector.broadcast %147 : vector<1x128xf32> to vector<8x128xf32>
    %149 = arith.addf %146, %148 : vector<8x128xf32>
    %cst_64 = arith.constant dense<0.000000e+00> : vector<8xf32>
    %150 = vector.multi_reduction <add>, %149, %cst_64 [1] : vector<8x128xf32> to vector<8xf32>
    %151 = vector.shape_cast %150 : vector<8xf32> to vector<8x1xf32>
    %cst_65 = arith.constant 3.125000e-02 : f32
    %152 = vector.broadcast %cst_65 : f32 to vector<8x1xf32>
    %153 = arith.mulf %151, %152 : vector<8x1xf32>
    %154 = arith.mulf %149, %149 : vector<8x128xf32>
    %cst_66 = arith.constant dense<0.000000e+00> : vector<8xf32>
    %155 = vector.multi_reduction <add>, %154, %cst_66 [1] : vector<8x128xf32> to vector<8xf32>
    %156 = vector.shape_cast %155 : vector<8xf32> to vector<8x1xf32>
    %cst_67 = arith.constant 3.125000e-02 : f32
    %157 = vector.broadcast %cst_67 : f32 to vector<8x1xf32>
    %158 = arith.mulf %156, %157 : vector<8x1xf32>
    %159 = arith.mulf %153, %153 : vector<8x1xf32>
    %160 = arith.subf %158, %159 : vector<8x1xf32>
    %cst_68 = arith.constant 0.000000e+00 : f32
    %161 = vector.broadcast %cst_68 : f32 to vector<8x1xf32>
    %162 = arith.maximumf %160, %161 : vector<8x1xf32>
    %163 = vector.broadcast %153 : vector<8x1xf32> to vector<8x128xf32>
    %164 = arith.subf %149, %163 : vector<8x128xf32>
    %cst_69 = arith.constant 9.99999974E-6 : f32
    %165 = vector.broadcast %cst_69 : f32 to vector<8x1xf32>
    %166 = arith.addf %162, %165 : vector<8x1xf32>
    %167 = math.rsqrt %166 : vector<8x1xf32>
    %168 = vector.broadcast %167 : vector<8x1xf32> to vector<8x128xf32>
    %169 = arith.mulf %164, %168 : vector<8x128xf32>
    %c13 = arith.constant 13 : index
    %c0_70 = arith.constant 0 : index
    %170 = vector.load %arg4[%c13, %c0_70] : memref<24x128xf32, #tpu.memory_space<vmem>>, vector<1x128xf32>
    %171 = vector.broadcast %170 : vector<1x128xf32> to vector<8x128xf32>
    %172 = arith.mulf %169, %171 : vector<8x128xf32>
    %c14 = arith.constant 14 : index
    %c0_71 = arith.constant 0 : index
    %173 = vector.load %arg4[%c14, %c0_71] : memref<24x128xf32, #tpu.memory_space<vmem>>, vector<1x128xf32>
    %174 = vector.broadcast %173 : vector<1x128xf32> to vector<8x128xf32>
    %175 = arith.addf %172, %174 : vector<8x128xf32>
    %cst_72 = arith.constant 0.000000e+00 : f32
    %176 = vector.broadcast %cst_72 : f32 to vector<8x128xf32>
    %177 = arith.maximumf %175, %176 : vector<8x128xf32>
    %c15 = arith.constant 15 : index
    %c0_73 = arith.constant 0 : index
    %178 = vector.load %arg4[%c15, %c0_73] : memref<24x128xf32, #tpu.memory_space<vmem>>, vector<1x128xf32>
    %179 = vector.broadcast %178 : vector<1x128xf32> to vector<8x128xf32>
    %180 = arith.mulf %177, %179 : vector<8x128xf32>
    %cst_74 = arith.constant dense<0.000000e+00> : vector<8xf32>
    %181 = vector.multi_reduction <add>, %180, %cst_74 [1] : vector<8x128xf32> to vector<8xf32>
    %182 = vector.shape_cast %181 : vector<8xf32> to vector<8x1xf32>
    %183 = tpu.iota {dimensions = array<i32: 1>} : vector<8x128xi32>
    %c0_i32 = arith.constant 0 : i32
    %184 = vector.broadcast %c0_i32 : i32 to vector<8x128xi32>
    %185 = arith.cmpi eq, %183, %184 : vector<8x128xi32>
    %cst_75 = arith.constant 0.000000e+00 : f32
    %186 = vector.shape_cast %182 : vector<8x1xf32> to vector<8x1xf32>
    %187 = vector.broadcast %186 : vector<8x1xf32> to vector<8x128xf32>
    %188 = vector.broadcast %cst_75 : f32 to vector<8x128xf32>
    %189 = arith.select %185, %187, %188 : vector<8x128xi1>, vector<8x128xf32>
    %c16 = arith.constant 16 : index
    %c0_76 = arith.constant 0 : index
    %190 = vector.load %arg4[%c16, %c0_76] : memref<24x128xf32, #tpu.memory_space<vmem>>, vector<1x128xf32>
    %191 = vector.broadcast %190 : vector<1x128xf32> to vector<8x128xf32>
    %192 = arith.addf %189, %191 : vector<8x128xf32>
    %c0_77 = arith.constant 0 : index
    %c0_78 = arith.constant 0 : index
    %193 = vector.load %arg5[%c0_77, %c0_78] : memref<8x128xf32, #tpu.memory_space<vmem>>, vector<8x128xf32>
    tpu.vector_store %arg5[%c0_77, %c0_78], %192 {strides = array<i32>} : memref<8x128xf32, #tpu.memory_space<vmem>>, vector<8x128xf32>,
    return
  }
  func.func @transform_0(%arg0: i32) -> (i32, i32) {
    %c0_i32 = arith.constant 0 : i32
    %c0_i32_0 = arith.constant 0 : i32
    return %arg0, %c0_i32 : i32, i32
  }
  func.func @transform_1(%arg0: i32) -> (i32, i32) {
    %c0_i32 = arith.constant 0 : i32
    %c0_i32_0 = arith.constant 0 : i32
    return %arg0, %c0_i32 : i32, i32
  }
  func.func @transform_2(%arg0: i32) -> (i32, i32, i32) {
    %c0_i32 = arith.constant 0 : i32
    %c0_i32_0 = arith.constant 0 : i32
    %c0_i32_1 = arith.constant 0 : i32
    %c0_i32_2 = arith.constant 0 : i32
    return %c0_i32, %c0_i32_0, %c0_i32_1 : i32, i32, i32
  }
  func.func @transform_3(%arg0: i32) -> (i32, i32) {
    %c0_i32 = arith.constant 0 : i32
    %c0_i32_0 = arith.constant 0 : i32
    %c0_i32_1 = arith.constant 0 : i32
    return %c0_i32, %c0_i32_0 : i32, i32
  }
  func.func @transform_4(%arg0: i32) -> (i32, i32) {
    %c0_i32 = arith.constant 0 : i32
    %c0_i32_0 = arith.constant 0 : i32
    return %arg0, %c0_i32 : i32, i32
  }
}

</mosaic_0001>

<bundles_post_ra>
// kernel: critic_forward.2
= control target key start
LH: loop header
LB: loop body
LE: loop exit
PB: predicated region body
PF: predicated region fallthrough
CT: control target
= control target key end

     0   :  { %s983_s0 = inlined_call_operand.vmem [shape: f32[8,128], index: 0, kind: input, shape index: {}]   ;;  %s984_s1 = inlined_call_operand.hbm [shape: bf16[5,128,128], index: 1, kind: input, shape index: {}]   ;;  %s985_s2 = inlined_call_operand.vmem [shape: f32[24,128], index: 2, kind: input, shape index: {}]   ;;  %s986_s3 = inlined_call_operand.vmem [shape: f32[4,16], index: 3, kind: input, shape index: {}]   ;;  %s987_s4 = inlined_call_operand.<no memory space> [shape: f32[], index: 4, kind: input, shape index: {}]   ;;  %s988_s5 = inlined_call_operand.vmem [shape: f32[8,128], index: 5, kind: output, shape index: {}]  }
   0x1   :  { %v10_v0 = vstv %s987_s4 }
   0x2   :  { %11 = vsyncpa [#allocation8], 0  ;;  %s20_s22 = sshll.u32 %s984_s1, 4  ;;  %s880_s23 = smov [#allocation7]   ;;  %s21_s22 = int_to_ptr.hbm [resolvable:$true] %s20_s22 }
   0x3   :  { %s22_s24 = sshll.u32 %s880_s23, 4  ;;  %s881_s25 = smov 64   ;;  %s23_s24 = int_to_ptr.vmem [resolvable:$true] %s22_s24 }
   0x4   :  { %s882_s26 = smov 4  }
   0x5   :  { %28 = dma.hbm_to_vmem [thread:$0]  %s21_s22, 5120, %s23_s24, [#allocation8], %s881_s25, %s881_s25, %s882_s26  }
   0x6   :  { %878 = dma.done.wait [#allocation8], 5120  }
   0x7   :  { %879 = vsyncadd [#allocation8], 4294962176  ;;  %v791_v1 = vld [vmem:[#allocation7 + $0x38] sm:$0xff]  ;;  %v790_v2 = vld [vmem:[#allocation7 + $0x30] sm:$0xff]  ;;  %v36_v5 = vlaneseq }
   0x8   :  { %117 = vmatpush.bf16.msra.mxu0 %v791_v1  ;;  %v789_v3 = vld [vmem:[#allocation7 + $0x28] sm:$0xff]  ;;  %v788_v4 = vld [vmem:[#allocation7 + $0x20] sm:$0xff]  ;;  %v787_v6 = vld [vmem:[#allocation7 + $0x18] sm:$0xff] }
   0x9   :  { %v37_v7 = vshrl.u32 %v36_v5, 7  ;;  %v786_v8 = vld [vmem:[#allocation7 + $0x10] sm:$0xff]  ;;  %v919_v9 = vand.u32 127, %v36_v5  ;;  %v35_v10 = vld [vmem:[%s986_s3] sm:$0xf]  ;;  %v785_v11 = vld [vmem:[#allocation7 + $0x8] sm:$0xff] }
   0xa   :  { %v784_v13 = vld [vmem:[#allocation7] sm:$0xff]  ;;  %v799_v21 = vld [vmem:[#allocation7 + $0x78] sm:$0xff]  ;;  %v798_v22 = vld [vmem:[#allocation7 + $0x70] sm:$0xff] }
   0xb   :  { %vm39_vm0 = vcmp.lt.s32.totalorder %v37_v7, 4  ;;  %vm44_vm1 = vcmp.lt.s32.totalorder %v919_v9, 16  ;;  %v827_v16 = vld [vmem:[%s985_s2] ss:$0 sm:$0xff]  ;;  %228 = vmatpush.bf16.msra.mxu1 %v799_v21  ;;  %v797_v23 = vld [vmem:[#allocation7 + $0x68] sm:$0xff]  ;;  %v795_v25 = vld [vmem:[#allocation7 + $0x58] sm:$0xff] }
   0xc   :  { %118 = vmatpush.bf16.msra.mxu0 %v790_v2  ;;  %v40_v12 = vsel %vm39_vm0, %v35_v10, %v10_v0  ;;  %v796_v24 = vld [vmem:[#allocation7 + $0x60] sm:$0xff]  ;;  %v794_v26 = vld [vmem:[#allocation7 + $0x50] sm:$0xff]  ;;  %v793_v28 = vld [vmem:[#allocation7 + $0x48] sm:$0xff] }
   0xd   :  { %v45_v14 = vsel %vm44_vm1, %v40_v12, %v10_v0  ;;  %v792_v30 = vld [vmem:[#allocation7 + $0x40] sm:$0xff]  ;;  %v807_v57 = vld [vmem:[#allocation7 + $0xb8] sm:$0xff]  ;;  %v806_v58 = vld [vmem:[#allocation7 + $0xb0] sm:$0xff]  ;;  %vm613_vm1 = vcmp.eq.s32.totalorder %v919_v9, 0 }
   0xe   :  { %v50_v15 = vpack.c.bf16 %v45_v14, %v45_v14  ;;  %v828_v44 = vld [vmem:[%s985_s2 + $0x1] ss:$0 sm:$0xff]  ;;  %v829_v47 = vld [vmem:[%s985_s2 + $0x2] ss:$0 sm:$0xff]  ;;  %v830_v52 = vld [vmem:[%s985_s2 + $0x3] ss:$0 sm:$0xff]  ;;  %339 = vmatpush.bf16.msra.mxu2 %v807_v57 }
   0xf   :  { %229 = vmatpush.bf16.msra.mxu1 %v798_v22  ;;  %v805_v59 = vld [vmem:[#allocation7 + $0xa8] sm:$0xff]  ;;  %v804_v60 = vld [vmem:[#allocation7 + $0xa0] sm:$0xff]  ;;  %v803_v61 = vld [vmem:[#allocation7 + $0x98] sm:$0xff] }
  0x10   :  { %119 = vmatpush.bf16.msra.mxu0 %v789_v3  ;;  %v802_v62 = vld [vmem:[#allocation7 + $0x90] sm:$0xff]  ;;  %v801_v0 = vld [vmem:[#allocation7 + $0x88] sm:$0xff]  ;;  %v800_v2 = vld [vmem:[#allocation7 + $0x80] sm:$0xff] }
  0x12   :  { %340 = vmatpush.bf16.msra.mxu2 %v806_v58 }
  0x13   :  { %230 = vmatpush.bf16.msra.mxu1 %v797_v23 }
  0x14   :  { %120 = vmatpush.bf16.msra.mxu0 %v788_v4 }
  0x16   :  { %341 = vmatpush.bf16.msra.mxu2 %v805_v59  ;;  %v382_v59 = vld [vmem:[%s983_s0] sm:$0xff] }
  0x17   :  { %231 = vmatpush.bf16.msra.mxu1 %v796_v24 }
  0x18   :  { %121 = vmatpush.bf16.msra.mxu0 %v787_v6 }
  0x1a   :  { %342 = vmatpush.bf16.msra.mxu2 %v804_v60 }
  0x1b   :  { %232 = vmatpush.bf16.msra.mxu1 %v795_v25  ;;  %v833_v25 = vld [vmem:[%s985_s2 + $0x6] ss:$0 sm:$0xff] }
  0x1c   :  { %122 = vmatpush.bf16.msra.mxu0 %v786_v8 }
  0x1e   :  { %343 = vmatpush.bf16.msra.mxu2 %v803_v61 }
  0x1f   :  { %233 = vmatpush.bf16.msra.mxu1 %v794_v26 }
  0x20   :  { %123 = vmatpush.bf16.msra.mxu0 %v785_v11 }
  0x22   :  { %344 = vmatpush.bf16.msra.mxu2 %v802_v62 }
  0x23   :  { %234 = vmatpush.bf16.msra.mxu1 %v793_v28 }
  0x24   :  { %124 = vmatpush.bf16.msra.mxu0 %v784_v13 }
  0x26   :  { %345 = vmatpush.bf16.msra.mxu2 %v801_v0 }
  0x27   :  { %125 = vmatmul.bf16.vlgmr.msra.gmra.mxu0 %v50_v15  ;;  %235 = vmatpush.bf16.msra.mxu1 %v792_v30  ;;  %v815_v30 = vld [vmem:[#allocation7 + $0xf8] sm:$0xff] }
  0x28   :  { %452 = vmatpush.bf16.msra.mxu3 %v815_v30 }
  0x2a   :  { %346 = vmatpush.bf16.msra.mxu2 %v800_v2 }
  0xa4   :  { %v126_v17 = vpop.f32.mrf.mxu0 }
  0xa5   :  { %v127_v18 = vadd.f32 %v827_v16, %v126_v17  ;;  %v831_v17 = vld [vmem:[%s985_s2 + $0x4] ss:$0 sm:$0xff] }
  0xa7   :  { %130 = vadd.xlane.f32.xlu0 %v127_v18  ;;  %v133_v20 = vmul.f32 %v127_v18, %v127_v18 }
  0xac   :  { %v128_v19 = vpop.f32.mrf.mxu0 }
  0xaf   :  { %134 = vadd.xlane.f32.xlu0 %v133_v20  ;;  %v832_v20 = vld [vmem:[%s985_s2 + $0x5] ss:$0 sm:$0xff] }
 0x11a   :  { %v131_v27 = vpop.xlane.xlu0 %130 }
 0x11b   :  { %v132_v29 = vmul.f32 0.03125, %v131_v27 }
 0x11d   :  { %v137_v32 = vmul.f32 %v132_v29, %v132_v29  ;;  %v140_v43 = vsub.f32 %v127_v18, %v132_v29 }
 0x122   :  { %v135_v31 = vpop.xlane.xlu0 %134 }
 0x123   :  { %v136_v33 = vmul.f32 0.03125, %v135_v31  ;;  %v814_v31 = vld [vmem:[#allocation7 + $0xf0] sm:$0xff] }
 0x124   :  { %453 = vmatpush.bf16.msra.mxu3 %v814_v31  ;;  %v838_v31 = vld [vmem:[%s985_s2 + $0xb] ss:$0 sm:$0xff] }
 0x125   :  { %v138_v34 = vsub.f32 %v136_v33, %v137_v32  ;;  %v813_v32 = vld [vmem:[#allocation7 + $0xe8] sm:$0xff]  ;;  %v812_v33 = vld [vmem:[#allocation7 + $0xe0] sm:$0xff] }
 0x127   :  { %v139_v35 = vmax.f32 %v138_v34, 0.0  ;;  %v811_v34 = vld [vmem:[#allocation7 + $0xd8] sm:$0xff] }
 0x128   :  { %454 = vmatpush.bf16.msra.mxu3 %v813_v32 }
 0x129   :  { %v141_v36 = vadd.f32 1e-05, %v139_v35 }
 0x12b   :  { %844 = vrsqrt.f32 %v141_v36  ;;  %vm148_vm3 = vweird.f32 %v141_v36 }
 0x12c   :  { %455 = vmatpush.bf16.msra.mxu3 %v812_v33 }
 0x130   :  { %456 = vmatpush.bf16.msra.mxu3 %v811_v34 }
 0x131   :  { %v845_v37 = vpop.eup %844 }
 0x132   :  { %v143_v38 = vmul.f32 %v845_v37, %v141_v36  ;;  %vm149_vm2 = vweird.f32 %v845_v37  ;;  %v810_v36 = vld [vmem:[#allocation7 + $0xd0] sm:$0xff] }
 0x133   :  { %vm150_vm4 = vmor %vm148_vm3, %vm149_vm2 }
 0x134   :  { %v144_v39 = vmul.f32 %v845_v37, %v143_v38  ;;  %457 = vmatpush.bf16.msra.mxu3 %v810_v36  ;;  %v839_v36 = vld [vmem:[%s985_s2 + $0xc] ss:$0 sm:$0xff] }
 0x136   :  { %v145_v40 = vmul.f32 0.5, %v144_v39 }
 0x138   :  { %v146_v41 = vsub.f32 1.5, %v145_v40  ;;  %v808_v40 = vld [vmem:[#allocation7 + $0xc0] sm:$0xff] }
 0x13a   :  { %v147_v42 = vmul.f32 %v845_v37, %v146_v41 }
 0x13c   :  { %v151_v45 = vsel %vm150_vm4, %v845_v37, %v147_v42  ;;  %v809_v37 = vld [vmem:[#allocation7 + $0xc8] sm:$0xff] }
 0x13d   :  { %v152_v46 = vmul.f32 %v151_v45, %v140_v43  ;;  %458 = vmatpush.bf16.msra.mxu3 %v809_v37 }
 0x13f   :  { %v155_v48 = vmul.f32 %v828_v44, %v152_v46 }
 0x141   :  { %v158_v49 = vadd.f32 %v829_v47, %v155_v48  ;;  %459 = vmatpush.bf16.msra.mxu3 %v808_v40 }
 0x143   :  { %v159_v50 = vmax.f32 %v158_v49, 0.0 }
 0x145   :  { %v160_v51 = vpack.c.bf16 %v159_v50, %v159_v50 }
 0x147   :  { %236 = vmatmul.bf16.vlgmr.msra.gmra.mxu1 %v160_v51 }
 0x1c4   :  { %v237_v53 = vpop.f32.mrf.mxu1 }
 0x1c5   :  { %v238_v54 = vadd.f32 %v830_v52, %v237_v53  ;;  %v834_v53 = vld [vmem:[%s985_s2 + $0x7] ss:$0 sm:$0xff] }
 0x1c7   :  { %241 = vadd.xlane.f32.xlu1 %v238_v54  ;;  %v244_v56 = vmul.f32 %v238_v54, %v238_v54 }
 0x1cc   :  { %v239_v55 = vpop.f32.mrf.mxu1 }
 0x1cf   :  { %245 = vadd.xlane.f32.xlu1 %v244_v56  ;;  %v835_v56 = vld [vmem:[%s985_s2 + $0x8] ss:$0 sm:$0xff] }
 0x23a   :  { %v242_v63 = vpop.xlane.xlu1 %241 }
 0x23b   :  { %v243_v1 = vmul.f32 0.03125, %v242_v63  ;;  %v836_v63 = vld [vmem:[%s985_s2 + $0x9] ss:$0 sm:$0xff] }
 0x23d   :  { %v248_v4 = vmul.f32 %v243_v1, %v243_v1  ;;  %v251_v16 = vsub.f32 %v238_v54, %v243_v1 }
 0x242   :  { %v246_v3 = vpop.xlane.xlu1 %245 }
 0x243   :  { %v247_v5 = vmul.f32 0.03125, %v246_v3 }
 0x245   :  { %v249_v6 = vsub.f32 %v247_v5, %v248_v4  ;;  %v823_v4 = vld [vmem:[#allocation7 + $0x138] sm:$0xff]  ;;  %v822_v5 = vld [vmem:[#allocation7 + $0x130] sm:$0xff] }
 0x246   :  { %563 = vmatpush.bf16.msrb.mxu0 %v823_v4 }
 0x247   :  { %v250_v7 = vmax.f32 %v249_v6, 0.0  ;;  %v821_v6 = vld [vmem:[#allocation7 + $0x128] sm:$0xff] }
 0x249   :  { %v252_v8 = vadd.f32 1e-05, %v250_v7  ;;  %v820_v7 = vld [vmem:[#allocation7 + $0x120] sm:$0xff] }
 0x24a   :  { %564 = vmatpush.bf16.msrb.mxu0 %v822_v5 }
 0x24b   :  { %846 = vrsqrt.f32 %v252_v8  ;;  %vm259_vm6 = vweird.f32 %v252_v8 }
 0x24e   :  { %565 = vmatpush.bf16.msrb.mxu0 %v821_v6 }
 0x251   :  { %v847_v10 = vpop.eup %846 }
 0x252   :  { %v254_v11 = vmul.f32 %v847_v10, %v252_v8  ;;  %vm260_vm5 = vweird.f32 %v847_v10  ;;  %566 = vmatpush.bf16.msrb.mxu0 %v820_v7  ;;  %v819_v8 = vld [vmem:[#allocation7 + $0x118] sm:$0xff] }
 0x253   :  { %vm261_vm7 = vmor %vm259_vm6, %vm260_vm5 }
 0x254   :  { %v255_v12 = vmul.f32 %v847_v10, %v254_v11  ;;  %v817_v11 = vld [vmem:[#allocation7 + $0x108] sm:$0xff] }
 0x256   :  { %v256_v13 = vmul.f32 0.5, %v255_v12  ;;  %567 = vmatpush.bf16.msrb.mxu0 %v819_v8 }
 0x258   :  { %v257_v14 = vsub.f32 1.5, %v256_v13  ;;  %v816_v13 = vld [vmem:[#allocation7 + $0x100] sm:$0xff] }
 0x25a   :  { %v258_v15 = vmul.f32 %v847_v10, %v257_v14 }
 0x25c   :  { %v262_v18 = vsel %vm261_vm7, %v847_v10, %v258_v15  ;;  %v818_v10 = vld [vmem:[#allocation7 + $0x110] sm:$0xff] }
 0x25d   :  { %v263_v19 = vmul.f32 %v262_v18, %v251_v16  ;;  %568 = vmatpush.bf16.msrb.mxu0 %v818_v10 }
 0x25f   :  { %v266_v21 = vmul.f32 %v831_v17, %v263_v19 }
 0x261   :  { %v269_v22 = vadd.f32 %v832_v20, %v266_v21  ;;  %569 = vmatpush.bf16.msrb.mxu0 %v817_v11 }
 0x263   :  { %v270_v23 = vmax.f32 %v269_v22, 0.0 }
 0x265   :  { %v271_v24 = vpack.c.bf16 %v270_v23, %v270_v23  ;;  %570 = vmatpush.bf16.msrb.mxu0 %v816_v13 }
 0x267   :  { %347 = vmatmul.bf16.vlgmr.msra.gmra.mxu2 %v271_v24 }
 0x2ea   :  { %v348_v26 = vpop.f32.mrf.mxu2 }
 0x2eb   :  { %v349_v27 = vadd.f32 %v833_v25, %v348_v26 }
 0x2ed   :  { %352 = vadd.xlane.f32.xlu2 %v349_v27  ;;  %v355_v29 = vmul.f32 %v349_v27, %v349_v27 }
 0x2f2   :  { %v350_v28 = vpop.f32.mrf.mxu2 }
 0x2f3   :  { %v837_v28 = vld [vmem:[%s985_s2 + $0xa] ss:$0 sm:$0xff] }
 0x2f5   :  { %356 = vadd.xlane.f32.xlu2 %v355_v29 }
 0x360   :  { %v353_v35 = vpop.xlane.xlu2 %352 }
 0x361   :  { %v354_v38 = vmul.f32 0.03125, %v353_v35 }
 0x363   :  { %v359_v41 = vmul.f32 %v354_v38, %v354_v38  ;;  %v362_v52 = vsub.f32 %v349_v27, %v354_v38 }
 0x368   :  { %v357_v39 = vpop.xlane.xlu2 %356 }
 0x369   :  { %v358_v42 = vmul.f32 0.03125, %v357_v39 }
 0x36b   :  { %v360_v43 = vsub.f32 %v358_v42, %v359_v41 }
 0x36d   :  { %v361_v44 = vmax.f32 %v360_v43, 0.0 }
 0x36f   :  { %v363_v45 = vadd.f32 1e-05, %v361_v44 }
 0x371   :  { %848 = vrsqrt.f32 %v363_v45  ;;  %vm370_vm9 = vweird.f32 %v363_v45 }
 0x377   :  { %v849_v46 = vpop.eup %848 }
 0x378   :  { %v365_v47 = vmul.f32 %v849_v46, %v363_v45  ;;  %vm371_vm8 = vweird.f32 %v849_v46 }
 0x379   :  { %vm372_vm10 = vmor %vm370_vm9, %vm371_vm8 }
 0x37a   :  { %v366_v48 = vmul.f32 %v849_v46, %v365_v47 }
 0x37c   :  { %v367_v49 = vmul.f32 0.5, %v366_v48 }
 0x37e   :  { %v368_v50 = vsub.f32 1.5, %v367_v49 }
 0x380   :  { %v369_v51 = vmul.f32 %v849_v46, %v368_v50 }
 0x382   :  { %v373_v54 = vsel %vm372_vm10, %v849_v46, %v369_v51 }
 0x383   :  { %v374_v55 = vmul.f32 %v373_v54, %v362_v52 }
 0x385   :  { %v377_v57 = vmul.f32 %v834_v53, %v374_v55 }
 0x387   :  { %v380_v58 = vadd.f32 %v835_v56, %v377_v57  ;;  %v840_v56 = vld [vmem:[%s985_s2 + $0xd] ss:$0 sm:$0xff] }
 0x389   :  { %v381_v60 = vmax.f32 %v380_v58, 0.0 }
 0x38b   :  { %v383_v61 = vadd.f32 %v382_v59, %v381_v60  ;;  %v841_v59 = vld [vmem:[%s985_s2 + $0xe] ss:$0 sm:$0xff] }
 0x38d   :  { %v384_v62 = vpack.c.bf16 %v383_v61, %v383_v61 }
 0x38f   :  { %460 = vmatmul.bf16.vlgmr.msra.gmra.mxu3 %v384_v62  ;;  %v842_v62 = vld [vmem:[%s985_s2 + $0xf] ss:$0 sm:$0xff] }
 0x412   :  { %v461_v0 = vpop.f32.mrf.mxu3 }
 0x413   :  { %v462_v1 = vadd.f32 %v836_v63, %v461_v0 }
 0x415   :  { %465 = vadd.xlane.f32.xlu0 %v462_v1  ;;  %v468_v2 = vmul.f32 %v462_v1, %v462_v1 }
 0x417   :  { %469 = vadd.xlane.f32.xlu1 %v468_v2 }
 0x41a   :  { %v463_v3 = vpop.f32.mrf.mxu3 }
 0x488   :  { %v466_v12 = vpop.xlane.xlu0 %465 }
 0x489   :  { %v467_v14 = vmul.f32 0.03125, %v466_v12 }
 0x48a   :  { %v470_v15 = vpop.xlane.xlu1 %469 }
 0x48b   :  { %v472_v16 = vmul.f32 %v467_v14, %v467_v14  ;;  %v471_v17 = vmul.f32 0.03125, %v470_v15  ;;  %v475_v27 = vsub.f32 %v462_v1, %v467_v14  ;;  %v843_v1 = vld [vmem:[%s985_s2 + $0x10] ss:$0 sm:$0xff] }
 0x48d   :  { %v473_v18 = vsub.f32 %v471_v17, %v472_v16 }
 0x48f   :  { %v474_v19 = vmax.f32 %v473_v18, 0.0 }
 0x491   :  { %v476_v20 = vadd.f32 1e-05, %v474_v19 }
 0x493   :  { %850 = vrsqrt.f32 %v476_v20  ;;  %vm483_vm12 = vweird.f32 %v476_v20 }
 0x499   :  { %v851_v21 = vpop.eup %850 }
 0x49a   :  { %v478_v22 = vmul.f32 %v851_v21, %v476_v20  ;;  %vm484_vm11 = vweird.f32 %v851_v21 }
 0x49b   :  { %vm485_vm13 = vmor %vm483_vm12, %vm484_vm11 }
 0x49c   :  { %v479_v23 = vmul.f32 %v851_v21, %v478_v22 }
 0x49e   :  { %v480_v24 = vmul.f32 0.5, %v479_v23 }
 0x4a0   :  { %v481_v25 = vsub.f32 1.5, %v480_v24 }
 0x4a2   :  { %v482_v26 = vmul.f32 %v851_v21, %v481_v25 }
 0x4a4   :  { %v486_v29 = vsel %vm485_vm13, %v851_v21, %v482_v26 }
 0x4a5   :  { %v487_v30 = vmul.f32 %v486_v29, %v475_v27 }
 0x4a7   :  { %v490_v32 = vmul.f32 %v837_v28, %v487_v30 }
 0x4a9   :  { %v493_v33 = vadd.f32 %v838_v31, %v490_v32 }
 0x4ab   :  { %v494_v34 = vmax.f32 %v493_v33, 0.0 }
 0x4ad   :  { %v495_v35 = vpack.c.bf16 %v494_v34, %v494_v34 }
 0x4af   :  { %571 = vmatmul.bf16.vlgmr.msrb.gmra.mxu0 %v495_v35 }
 0x52c   :  { %v572_v37 = vpop.f32.mrf.mxu0 }
 0x52d   :  { %v573_v38 = vadd.f32 %v839_v36, %v572_v37 }
 0x52f   :  { %576 = vadd.xlane.f32.xlu2 %v573_v38  ;;  %v579_v39 = vmul.f32 %v573_v38, %v573_v38 }
 0x531   :  { %580 = vadd.xlane.f32.xlu0 %v579_v39 }
 0x534   :  { %v574_v40 = vpop.f32.mrf.mxu0 }
 0x5a2   :  { %v577_v41 = vpop.xlane.xlu2 %576 }
 0x5a3   :  { %v578_v42 = vmul.f32 0.03125, %v577_v41 }
 0x5a4   :  { %v581_v43 = vpop.xlane.xlu0 %580 }
 0x5a5   :  { %v583_v44 = vmul.f32 %v578_v42, %v578_v42  ;;  %v582_v45 = vmul.f32 0.03125, %v581_v43  ;;  %v586_v55 = vsub.f32 %v573_v38, %v578_v42 }
 0x5a7   :  { %v584_v46 = vsub.f32 %v582_v45, %v583_v44 }
 0x5a9   :  { %v585_v47 = vmax.f32 %v584_v46, 0.0 }
 0x5ab   :  { %v587_v48 = vadd.f32 1e-05, %v585_v47 }
 0x5ad   :  { %852 = vrsqrt.f32 %v587_v48  ;;  %vm594_vm15 = vweird.f32 %v587_v48 }
 0x5b3   :  { %v853_v49 = vpop.eup %852 }
 0x5b4   :  { %v589_v50 = vmul.f32 %v853_v49, %v587_v48  ;;  %vm595_vm14 = vweird.f32 %v853_v49 }
 0x5b5   :  { %vm596_vm0 = vmor %vm594_vm15, %vm595_vm14 }
 0x5b6   :  { %v590_v51 = vmul.f32 %v853_v49, %v589_v50 }
 0x5b8   :  { %v591_v52 = vmul.f32 0.5, %v590_v51 }
 0x5ba   :  { %v592_v53 = vsub.f32 1.5, %v591_v52 }
 0x5bc   :  { %v593_v54 = vmul.f32 %v853_v49, %v592_v53 }
 0x5be   :  { %v597_v57 = vsel %vm596_vm0, %v853_v49, %v593_v54 }
 0x5bf   :  { %v598_v58 = vmul.f32 %v597_v57, %v586_v55 }
 0x5c1   :  { %v601_v60 = vmul.f32 %v840_v56, %v598_v58 }
 0x5c3   :  { %v604_v61 = vadd.f32 %v841_v59, %v601_v60 }
 0x5c5   :  { %v605_v63 = vmax.f32 %v604_v61, 0.0 }
 0x5c7   :  { %v608_v0 = vmul.f32 %v842_v62, %v605_v63 }
 0x5c9   :  { %609 = vadd.xlane.f32.xlu1 %v608_v0 }
 0x63c   :  { %v610_v2 = vpop.xlane.xlu1 %609 }
 0x63d   :  { %v614_v3 = vsel %vm613_vm1, %v610_v2, 0.0 }
 0x63e   :  { %v617_v4 = vadd.f32 %v843_v1, %v614_v3 }
 0x640   :  { %618 = vst [vmem:[%s988_s5] sm:$0xff] %v617_v4 }
 0x641   :  { %623 = vsyncpa [#allocation8], 1 }

</bundles_post_ra>
